<compile_context>
chip_gen: v7x
topology: tpu7x:2x2x1
jax: 0.10.0
libtpu: 0.0.40
codegen_flags: <defaults>
</compile_context>

<pallas_src>
import numpy as np
import jax
import jax.numpy as jnp
from jax.experimental import pallas as pl
from jax.experimental.pallas import tpu as pltpu


# ---------------------------------------------------------------------------
# librosa-style mel filterbank (slaney scale, slaney norm), built in numpy.
# ---------------------------------------------------------------------------
def _hz_to_mel(f):
    f = np.asarray(f, dtype=np.float64)
    f_sp = 200.0 / 3
    mels = f / f_sp
    min_log_hz = 1000.0
    min_log_mel = min_log_hz / f_sp
    logstep = np.log(6.4) / 27.0
    return np.where(f >= min_log_hz,
                    min_log_mel + np.log(np.maximum(f, 1e-10) / min_log_hz) / logstep,
                    mels)


def _mel_to_hz(m):
    m = np.asarray(m, dtype=np.float64)
    f_sp = 200.0 / 3
    freqs = f_sp * m
    min_log_hz = 1000.0
    min_log_mel = min_log_hz / f_sp
    logstep = np.log(6.4) / 27.0
    return np.where(m >= min_log_mel,
                    min_log_hz * np.exp(logstep * (m - min_log_mel)),
                    freqs)


def librosa_mel_fn(sr, n_fft, n_mels, fmin, fmax):
    n_freq = n_fft // 2 + 1
    fftfreqs = np.linspace(0.0, sr / 2.0, n_freq)
    mel_f = _mel_to_hz(np.linspace(_hz_to_mel(fmin), _hz_to_mel(fmax), n_mels + 2))
    fdiff = np.diff(mel_f)
    ramps = mel_f[:, None] - fftfreqs[None, :]
    weights = np.zeros((n_mels, n_freq), dtype=np.float64)
    for i in range(n_mels):
        lower = -ramps[i] / fdiff[i]
        upper = ramps[i + 2] / fdiff[i + 1]
        weights[i] = np.maximum(0.0, np.minimum(lower, upper))
    enorm = 2.0 / (mel_f[2:n_mels + 2] - mel_f[:n_mels])
    weights *= enorm[:, None]
    return weights.astype(np.float32)


# ---------------------------------------------------------------------------
# Pallas kernel: (windowed) DFT as one matmul -> magnitude -> mel matmul -> log10
# ---------------------------------------------------------------------------
def audio2mel_kernel(frames_ref, dft_ref, melT_ref, out_ref):
    # frames_ref: (tile_n, n_fft)    -- window already folded into dft_ref
    # dft_ref:    (n_fft, 2*F_pad)   -- [win*cos | -win*sin]
    # melT_ref:   (F_pad, n_mel_pad)
    # out_ref:    (tile_n, n_mel_pad)
    y = jnp.dot(frames_ref[...], dft_ref[...],
                preferred_element_type=jnp.float32)          # (tile_n, 2*F_pad)
    f_pad = y.shape[1] // 2                                  # static; multiple of 128
    real = y[:, :f_pad]
    imag = y[:, f_pad:]
    mag = jnp.sqrt(real * real + imag * imag)                # f32 element-wise (VPU/EUP)
    mel = jnp.dot(mag.astype(melT_ref.dtype), melT_ref[...],
                  preferred_element_type=jnp.float32)        # (tile_n, n_mel_pad)
    out_ref[...] = (jnp.log(jnp.maximum(mel, 1e-5)) *
                    jnp.float32(1.0 / np.log(10.0))).astype(out_ref.dtype)


class Audio2MelPallas:
    def __init__(self, sampling_rate=16000, n_fft=256, hop_length=64,
                 win_length=256, n_mel_channels=64, mel_fmin=0.0, mel_fmax=8000.0,
                 tile_n=512, matmul_dtype=jnp.float32):
        assert win_length == n_fft, "win_length < n_fft window padding not implemented here"
        self.n_fft = n_fft
        self.hop_length = hop_length
        self.win_length = win_length
        self.n_mel_channels = n_mel_channels
        self.tile_n = max(8, (tile_n // 8) * 8)              # multiple of 8 sublanes
        self.matmul_dtype = matmul_dtype                      # bf16 on v6e/v7x for ~3-4x MXU

        n_freq = n_fft // 2 + 1
        # Pad frequency axis to a lane-friendly multiple of 128 (extra bins are zero).
        self.f_pad = int(np.ceil(n_freq / 128.0) * 128)
        # Pad mel axis to >=128 so the output block is lane-dense (unmasked vst).
        self.n_mel_pad = int(np.ceil(max(n_mel_channels, 128) / 128.0) * 128)

        # Hann window (periodic, matching torch.hann_window default).
        n = np.arange(win_length, dtype=np.float64)
        window = 0.5 * (1.0 - np.cos(2.0 * np.pi * n / win_length))      # (n_fft,)

        # Real-input DFT matrices with the window folded in:
        #   real = x @ (diag(w) @ cos),  imag = x @ (diag(w) @ (-sin))
        # Fused into one (n_fft, 2*F_pad) matrix -> single MXU launch per tile.
        nn_ = np.arange(n_fft, dtype=np.float64)[:, None]
        kk = np.arange(n_freq, dtype=np.float64)[None, :]
        ang = 2.0 * np.pi * nn_ * kk / n_fft
        dft = np.zeros((n_fft, 2 * self.f_pad), dtype=np.float64)
        dft[:, :n_freq] = window[:, None] * np.cos(ang)
        dft[:, self.f_pad:self.f_pad + n_freq] = window[:, None] * (-np.sin(ang))
        self.dft = jnp.asarray(dft, dtype=matmul_dtype)                  # (n_fft, 2*F_pad)

        # Mel filterbank, transposed + zero-padded on both axes.
        mel_basis = librosa_mel_fn(sampling_rate, n_fft, n_mel_channels, mel_fmin, mel_fmax)
        melT = np.zeros((self.f_pad, self.n_mel_pad), dtype=np.float32)
        melT[:n_freq, :n_mel_channels] = mel_basis.T
        self.melT = jnp.asarray(melT, dtype=matmul_dtype)                # (F_pad, n_mel_pad)

    def __call__(self, audio):
        # audio: (B, 1, T) float32, like the PyTorch module input.
        B = audio.shape[0]
        p = (self.n_fft - self.hop_length) // 2

        # Glue: reflect pad + squeeze + framing (pure indexing / reshapes).
        # TODO(synk): for long audio, stream contiguous audio slabs into the kernel
        # (memory_space=pl.ANY + manual DMA) instead of this 4x frame-expansion gather.
        x = jnp.pad(audio, ((0, 0), (0, 0), (p, p)), mode="reflect")[:, 0, :]  # (B, T+2p)
        L = x.shape[1]
        n_frames = 1 + (L - self.n_fft) // self.hop_length
        idx = (jnp.arange(n_frames)[:, None] * self.hop_length
               + jnp.arange(self.n_fft)[None, :])                               # (n_frames, n_fft)
        frames = x[:, idx].reshape(B * n_frames, self.n_fft)                    # (N, n_fft)
        frames = frames.astype(self.matmul_dtype)

        N = frames.shape[0]

        # Tile selection: big enough to fill the MXU M-dim, but keep >=4 grid steps
        # when possible (v7x megacore sharding) and never wider than the problem.
        tile_n = self.tile_n
        while tile_n > 128 and N < 4 * tile_n:
            tile_n //= 2
        tile_n = max(8, min(tile_n, ((N + 7) // 8) * 8))

        n_pad = (-N) % tile_n
        if n_pad:
            frames = jnp.pad(frames, ((0, n_pad), (0, 0)))
        N_pad = frames.shape[0]

        out = pl.pallas_call(
            audio2mel_kernel,
            out_shape=jax.ShapeDtypeStruct((N_pad, self.n_mel_pad), jnp.float32),
            grid_spec=pltpu.PrefetchScalarGridSpec(
                num_scalar_prefetch=0,
                grid=(N_pad // tile_n,),
                in_specs=[
                    pl.BlockSpec((tile_n, self.n_fft), lambda i: (i, 0)),
                    # Constant operands: index_map never changes, so the runtime
                    # DMAs them into VMEM once and reuses them across grid steps.
                    pl.BlockSpec((self.n_fft, 2 * self.f_pad), lambda i: (0, 0)),
                    pl.BlockSpec((self.f_pad, self.n_mel_pad), lambda i: (0, 0)),
                ],
                out_specs=pl.BlockSpec((tile_n, self.n_mel_pad), lambda i: (i, 0)),
            ),
            compiler_params=pltpu.CompilerParams(
                dimension_semantics=("parallel",),
                vmem_limit_bytes=64 * 1024 * 1024),
        )(frames, self.dft, self.melT)

        out = out[:N, :self.n_mel_channels].reshape(B, n_frames, self.n_mel_channels)
        return jnp.transpose(out, (0, 2, 1))  # (B, n_mel_channels, n_frames)


if __name__ == "__main__":
    key = jax.random.PRNGKey(0)
    B, T = 2, 1024
    audio = jax.random.normal(key, (B, 1, T), dtype=jnp.float32)  # (batch, 1, samples)

    model = Audio2MelPallas(sampling_rate=16000, n_fft=256, hop_length=64,
                            win_length=256, n_mel_channels=64,
                            mel_fmin=0.0, mel_fmax=8000.0)
    log_mel = model(audio)
    jax.block_until_ready(log_mel)

    # Sanity: expected shape (B, n_mel, n_frames) with n_frames = 1 + (T + 2p - n_fft)//hop
    p = (256 - 64) // 2
    exp_frames = 1 + (T + 2 * p - 256) // 64
    assert log_mel.shape == (B, 64, exp_frames), log_mel.shape
    assert bool(jnp.all(jnp.isfinite(log_mel)))
    print("KERNEL_OK")
</pallas_src>

<mosaic_0001>
module attributes {stable_mosaic.version = 11 : i64} {
  func.func @audio2mel_kernel(%arg0: i32, %arg1: memref<32x256xf32, #tpu.memory_space<vmem>>, %arg2: memref<256x512xf32, #tpu.memory_space<vmem>>, %arg3: memref<256x128xf32, #tpu.memory_space<vmem>>, %arg4: memref<32x128xf32, #tpu.memory_space<vmem>>) attributes {dimension_semantics = [#tpu.dimension_semantics<parallel>], iteration_bounds = array<i64: 1>, scalar_prefetch = 0 : i64, scratch_operands = 0 : i64, tpu.core_type = #tpu.core_type<tc>, window_params = [{transform_indices = @transform_0, window_bounds = array<i64: 32, 256>}, {pipeline_mode = #tpu.pipeline_mode<synchronous>, transform_indices = @transform_1, window_bounds = array<i64: 256, 512>}, {pipeline_mode = #tpu.pipeline_mode<synchronous>, transform_indices = @transform_2, window_bounds = array<i64: 256, 128>}, {transform_indices = @transform_3, window_bounds = array<i64: 32, 128>}]} {
    %c0 = arith.constant 0 : index
    %c0_0 = arith.constant 0 : index
    %0 = vector.load %arg1[%c0, %c0_0] : memref<32x256xf32, #tpu.memory_space<vmem>>, vector<32x256xf32>
    %c0_1 = arith.constant 0 : index
    %c0_2 = arith.constant 0 : index
    %1 = vector.load %arg2[%c0_1, %c0_2] : memref<256x512xf32, #tpu.memory_space<vmem>>, vector<256x512xf32>
    %cst = arith.constant dense<0.000000e+00> : vector<32x512xf32>
    %2 = tpu.matmul %0, %1, %cst {dimension_numbers = #tpu.dot_dimension_numbers<[1], [0], [0], [1], [0, 0, 1, 1], [], []>} : vector<32x256xf32>, vector<256x512xf32>, vector<32x512xf32> -> vector<32x512xf32>
    %3 = vector.extract_strided_slice %2 {offsets = [0, 0], sizes = [32, 256], strides = [1, 1]} : vector<32x512xf32> to vector<32x256xf32>
    %4 = vector.extract_strided_slice %2 {offsets = [0, 256], sizes = [32, 256], strides = [1, 1]} : vector<32x512xf32> to vector<32x256xf32>
    %5 = arith.mulf %3, %3 : vector<32x256xf32>
    %6 = arith.mulf %4, %4 : vector<32x256xf32>
    %7 = arith.addf %5, %6 : vector<32x256xf32>
    %8 = math.sqrt %7 : vector<32x256xf32>
    %c0_3 = arith.constant 0 : index
    %c0_4 = arith.constant 0 : index
    %9 = vector.load %arg3[%c0_3, %c0_4] : memref<256x128xf32, #tpu.memory_space<vmem>>, vector<256x128xf32>
    %cst_5 = arith.constant dense<0.000000e+00> : vector<32x128xf32>
    %10 = tpu.matmul %8, %9, %cst_5 {dimension_numbers = #tpu.dot_dimension_numbers<[1], [0], [0], [1], [0, 0, 1, 1], [], []>} : vector<32x256xf32>, vector<256x128xf32>, vector<32x128xf32> -> vector<32x128xf32>
    %cst_6 = arith.constant 9.99999974E-6 : f32
    %11 = vector.broadcast %cst_6 : f32 to vector<32x128xf32>
    %12 = arith.maximumf %10, %11 : vector<32x128xf32>
    %13 = math.log %12 : vector<32x128xf32>
    %cst_7 = arith.constant 0.434294492 : f32
    %14 = vector.broadcast %cst_7 : f32 to vector<32x128xf32>
    %15 = arith.mulf %13, %14 : vector<32x128xf32>
    %c0_8 = arith.constant 0 : index
    %c0_9 = arith.constant 0 : index
    %16 = vector.load %arg4[%c0_8, %c0_9] : memref<32x128xf32, #tpu.memory_space<vmem>>, vector<32x128xf32>
    tpu.vector_store %arg4[%c0_8, %c0_9], %15 {strides = array<i32>} : memref<32x128xf32, #tpu.memory_space<vmem>>, vector<32x128xf32>,
    return
  }
  func.func @transform_0(%arg0: i32) -> (i32, i32) {
    %c0_i32 = arith.constant 0 : i32
    %c0_i32_0 = arith.constant 0 : i32
    return %arg0, %c0_i32 : i32, i32
  }
  func.func @transform_1(%arg0: i32) -> (i32, i32) {
    %c0_i32 = arith.constant 0 : i32
    %c0_i32_0 = arith.constant 0 : i32
    %c0_i32_1 = arith.constant 0 : i32
    return %c0_i32, %c0_i32_0 : i32, i32
  }
  func.func @transform_2(%arg0: i32) -> (i32, i32) {
    %c0_i32 = arith.constant 0 : i32
    %c0_i32_0 = arith.constant 0 : i32
    %c0_i32_1 = arith.constant 0 : i32
    return %c0_i32, %c0_i32_0 : i32, i32
  }
  func.func @transform_3(%arg0: i32) -> (i32, i32) {
    %c0_i32 = arith.constant 0 : i32
    %c0_i32_0 = arith.constant 0 : i32
    return %arg0, %c0_i32 : i32, i32
  }
}

</mosaic_0001>

<bundles_post_ra>
// kernel: tpu_custom_call.1
= control target key start
LH: loop header
LB: loop body
LE: loop exit
PB: predicated region body
PF: predicated region fallthrough
CT: control target
= control target key end

     0   :  { %8 = vsyncpa [#allocation3], 0  ;;  %s1061_s0 = inlined_call_operand.hbm [shape: f32[32,256], index: 0, kind: input, shape index: {}]   ;;  %s1062_s1 = inlined_call_operand.hbm [shape: f32[256,512], index: 1, kind: input, shape index: {}]   ;;  %s1063_s2 = inlined_call_operand.hbm [shape: f32[256,128], index: 2, kind: input, shape index: {}]   ;;  %s1064_s3 = inlined_call_operand.hbm [shape: f32[32,128], index: 3, kind: output, shape index: {}]  }
   0x1   :  { %9 = vsyncpa [#allocation6], 0 }
   0x2   :  { %10 = vsyncpa [#allocation4], 0  ;;  %s953_s12 = smov [#allocation5]   ;;  %s859_s16 = scalar_lea.hbm %s1062_s1, 16384 }
   0x3   :  { %s28_s13 = sshll.u32 %s953_s12, 4  ;;  %p860_p0 = scmp.ne.s32.totalorder %s1062_s1, %s859_s16  ;;  %s29_s13 = int_to_ptr.vmem [resolvable:$true] %s28_s13 }
   0x4   :  { %p863_p1 = scmp.lt.u32.totalorder %s859_s16, %s1062_s1 }
   0x6   :  { %p865_p2 = pnand %p863_p1, %p860_p0 }
   0x8   :  { %868 = shalt.err (!%p865_p2)
}
   0x9   :  { %s869_s21 = scalar_lea.vmem %s29_s13, 16384  ;;  %p874_p4 = scmp.lt.s32.totalorder %s29_s13, %s29_s13 }
   0xa   :  { %p870_p3 = scmp.ne.s32.totalorder %s29_s13, %s869_s21  ;;  %p875_p5 = scmp.lt.s32.totalorder %s869_s21, %s869_s21 }
   0xc   :  { %p876_p6 = por %p875_p5, %p874_p4 }
   0xe   :  { %p877_p7 = pnand %p876_p6, %p870_p3 }
  0x10   :  { %880 = shalt.err (!%p877_p7)
}
  0x11   :  { %s954_s22 = smov 512   ;;  %s955_s23 = smov 32  }
  0x12   :  { %34 = dma.hbm_to_vmem [thread:$0]  %s1062_s1, 16384, %s29_s13, [#allocation6], %s954_s22, %s954_s22, %s955_s23  }
  0x13   :  { %s956_s26 = smov [#allocation2]   ;;  %s881_s30 = scalar_lea.hbm %s1061_s0, 1024 }
  0x14   :  { %s16_s27 = sshll.u32 %s956_s26, 4  ;;  %p882_p8 = scmp.ne.s32.totalorder %s1061_s0, %s881_s30  ;;  %s17_s27 = int_to_ptr.vmem [resolvable:$true] %s16_s27 }
  0x15   :  { %p885_p9 = scmp.lt.u32.totalorder %s881_s30, %s1061_s0 }
  0x17   :  { %p887_p10 = pnand %p885_p9, %p882_p8 }
  0x19   :  { %890 = shalt.err (!%p887_p10)
}
  0x1a   :  { %s891_s8 = scalar_lea.vmem %s17_s27, 1024  ;;  %p896_p12 = scmp.lt.s32.totalorder %s17_s27, %s17_s27 }
  0x1b   :  { %p892_p11 = scmp.ne.s32.totalorder %s17_s27, %s891_s8  ;;  %p897_p13 = scmp.lt.s32.totalorder %s891_s8, %s891_s8 }
  0x1d   :  { %p898_p0 = por %p897_p13, %p896_p12 }
  0x1f   :  { %p899_p1 = pnand %p898_p0, %p892_p11 }
  0x21   :  { %902 = shalt.err (!%p899_p1)
}
  0x22   :  { %s957_s1 = smov 256   ;;  %s958_s9 = smov 16  }
  0x23   :  { %22 = dma.hbm_to_vmem [thread:$0]  %s1061_s0, 1024, %s17_s27, [#allocation3], %s957_s1, %s957_s1, %s958_s9  }
  0x24   :  { %s959_s12 = smov [#allocation7]   ;;  %s903_s16 = scalar_lea.hbm %s1063_s2, 4096 }
  0x25   :  { %s40_s13 = sshll.u32 %s959_s12, 4  ;;  %p904_p2 = scmp.ne.s32.totalorder %s1063_s2, %s903_s16  ;;  %s41_s13 = int_to_ptr.vmem [resolvable:$true] %s40_s13 }
  0x26   :  { %p907_p3 = scmp.lt.u32.totalorder %s903_s16, %s1063_s2 }
  0x28   :  { %p909_p4 = pnand %p907_p3, %p904_p2 }
  0x2a   :  { %912 = shalt.err (!%p909_p4)
}
  0x2b   :  { %s913_s21 = scalar_lea.vmem %s41_s13, 4096  ;;  %p918_p6 = scmp.lt.s32.totalorder %s41_s13, %s41_s13 }
  0x2c   :  { %p914_p5 = scmp.ne.s32.totalorder %s41_s13, %s913_s21  ;;  %p919_p7 = scmp.lt.s32.totalorder %s913_s21, %s913_s21 }
  0x2e   :  { %p920_p8 = por %p919_p7, %p918_p6 }
  0x30   :  { %p921_p9 = pnand %p920_p8, %p914_p5 }
  0x32   :  { %924 = shalt.err (!%p921_p9)
}
  0x33   :  { %s960_s0 = smov 128   ;;  %s961_s22 = smov 8  }
  0x34   :  { %46 = dma.hbm_to_vmem [thread:$0]  %s1063_s2, 4096, %s41_s13, [#allocation6], %s960_s0, %s960_s0, %s961_s22  }
  0x35   :  { %947 = dma.done.wait [#allocation3], 1024  }
  0x36   :  { %948 = vsyncadd [#allocation3], 4294966272 }
  0x37   :  { %949 = dma.done.wait [#allocation6], 20480  }
  0x38   :  { %950 = vsyncadd [#allocation6], 4294946816  ;;  %v65_v0 = vld [vmem:[#allocation5 + $0x8] sm:$0xff]  ;;  %v67_v2 = vld [vmem:[#allocation5 + $0x18] sm:$0xff]  ;;  %s962_s2 = smov [#allocation8]  }
  0x39   :  { %v69_v1 = vld [vmem:[#allocation5 + $0x28] sm:$0xff]  ;;  %v71_v4 = vld [vmem:[#allocation5 + $0x38] sm:$0xff]  ;;  %v64_v5 = vld [vmem:[#allocation5] sm:$0xff]  ;;  %s592_s25 = sshll.u32 %s962_s2, 4  ;;  %s593_s25 = int_to_ptr.vmem [resolvable:$true] %s592_s25 }
  0x3a   :  { %v649_v3 = vpack.c.bf16 %v69_v1, %v65_v0  ;;  %v68_v6 = vld [vmem:[#allocation5 + $0x20] sm:$0xff]  ;;  %v713_v7 = vpack.c.bf16 %v71_v4, %v67_v2  ;;  %v66_v9 = vld [vmem:[#allocation5 + $0x10] sm:$0xff]  ;;  %v73_v11 = vld [vmem:[#allocation5 + $0x48] sm:$0xff]  ;;  %s925_s26 = scalar_lea.vmem %s593_s25, 512  ;;  %p930_p11 = scmp.lt.s32.totalorder %s593_s25, %s593_s25 }
  0x3b   :  { %v651_v8 = vpack.c.bf16 %v68_v6, %v64_v5  ;;  %v70_v10 = vld [vmem:[#allocation5 + $0x30] sm:$0xff]  ;;  %v77_v13 = vld [vmem:[#allocation5 + $0x68] sm:$0xff]  ;;  %v75_v14 = vld [vmem:[#allocation5 + $0x58] sm:$0xff]  ;;  %p926_p10 = scmp.ne.s32.totalorder %s593_s25, %s925_s26  ;;  %p931_p12 = scmp.lt.s32.totalorder %s925_s26, %s925_s26 }
  0x3c   :  { %650 = vmatprep.subr.bf16.mxu0 %v649_v3  ;;  %v715_v12 = vpack.c.bf16 %v70_v10, %v66_v9  ;;  %v79_v15 = vld [vmem:[#allocation5 + $0x78] sm:$0xff]  ;;  %714 = vmatprep.subr.bf16.mxu1 %v713_v7  ;;  %v653_v16 = vpack.c.bf16 %v77_v13, %v73_v11  ;;  %v72_v18 = vld [vmem:[#allocation5 + $0x40] sm:$0xff]  ;;  %v74_v20 = vld [vmem:[#allocation5 + $0x50] sm:$0xff] }
  0x3d   :  { %652 = vmatpush1.bf16.msra.mxu0 %v651_v8  ;;  %v717_v17 = vpack.c.bf16 %v79_v15, %v75_v14  ;;  %v76_v19 = vld [vmem:[#allocation5 + $0x60] sm:$0xff]  ;;  %v78_v22 = vld [vmem:[#allocation5 + $0x70] sm:$0xff]  ;;  %v81_v23 = vld [vmem:[#allocation5 + $0x88] sm:$0xff]  ;;  %p932_p13 = por %p931_p12, %p930_p11 }
  0x3e   :  { %716 = vmatpush1.bf16.msra.mxu1 %v715_v12  ;;  %v655_v21 = vpack.c.bf16 %v76_v19, %v72_v18  ;;  %v85_v24 = vld [vmem:[#allocation5 + $0xa8] sm:$0xff]  ;;  %654 = vmatprep.subr.bf16.mxu0 %v653_v16  ;;  %v719_v25 = vpack.c.bf16 %v78_v22, %v74_v20  ;;  %v83_v27 = vld [vmem:[#allocation5 + $0x98] sm:$0xff]  ;;  %v80_v29 = vld [vmem:[#allocation5 + $0x80] sm:$0xff] }
  0x3f   :  { %718 = vmatprep.subr.bf16.mxu1 %v717_v17  ;;  %v657_v26 = vpack.c.bf16 %v85_v24, %v81_v23  ;;  %v87_v28 = vld [vmem:[#allocation5 + $0xb8] sm:$0xff]  ;;  %v84_v31 = vld [vmem:[#allocation5 + $0xa0] sm:$0xff]  ;;  %v82_v32 = vld [vmem:[#allocation5 + $0x90] sm:$0xff]  ;;  %p933_p0 = pnand %p932_p13, %p926_p10 }
  0x40   :  { %v721_v30 = vpack.c.bf16 %v87_v28, %v83_v27  ;;  %v86_v33 = vld [vmem:[#allocation5 + $0xb0] sm:$0xff]  ;;  %v659_v34 = vpack.c.bf16 %v84_v31, %v80_v29  ;;  %v89_v35 = vld [vmem:[#allocation5 + $0xc8] sm:$0xff]  ;;  %v91_v37 = vld [vmem:[#allocation5 + $0xd8] sm:$0xff] }
  0x41   :  { %656 = vmatpush1.bf16.msra.mxu0 %v655_v21  ;;  %v93_v36 = vld [vmem:[#allocation5 + $0xe8] sm:$0xff]  ;;  %v723_v38 = vpack.c.bf16 %v86_v33, %v82_v32  ;;  %v95_v40 = vld [vmem:[#allocation5 + $0xf8] sm:$0xff]  ;;  %v88_v41 = vld [vmem:[#allocation5 + $0xc0] sm:$0xff] }
  0x42   :  { %720 = vmatpush1.bf16.msra.mxu1 %v719_v25  ;;  %658 = vmatprep.subr.bf16.mxu0 %v657_v26  ;;  %v661_v39 = vpack.c.bf16 %v93_v36, %v89_v35  ;;  %v92_v42 = vld [vmem:[#allocation5 + $0xe0] sm:$0xff]  ;;  %v725_v43 = vpack.c.bf16 %v95_v40, %v91_v37  ;;  %v90_v44 = vld [vmem:[#allocation5 + $0xd0] sm:$0xff]  ;;  %v97_v46 = vld [vmem:[#allocation5 + $0x108] sm:$0xff] }
  0x43   :  { %722 = vmatprep.subr.bf16.mxu1 %v721_v30  ;;  %v94_v45 = vld [vmem:[#allocation5 + $0xf0] sm:$0xff]  ;;  %v101_v47 = vld [vmem:[#allocation5 + $0x128] sm:$0xff]  ;;  %v99_v48 = vld [vmem:[#allocation5 + $0x118] sm:$0xff]  ;;  %v663_v50 = vpack.c.bf16 %v92_v42, %v88_v41 }
  0x44   :  { %v103_v49 = vld [vmem:[#allocation5 + $0x138] sm:$0xff]  ;;  %v727_v51 = vpack.c.bf16 %v94_v45, %v90_v44  ;;  %v665_v52 = vpack.c.bf16 %v101_v47, %v97_v46  ;;  %v96_v53 = vld [vmem:[#allocation5 + $0x100] sm:$0xff]  ;;  %v98_v55 = vld [vmem:[#allocation5 + $0x110] sm:$0xff] }
  0x45   :  { %660 = vmatpush1.bf16.msra.mxu0 %v659_v34  ;;  %v100_v54 = vld [vmem:[#allocation5 + $0x120] sm:$0xff]  ;;  %v729_v56 = vpack.c.bf16 %v103_v49, %v99_v48  ;;  %v102_v57 = vld [vmem:[#allocation5 + $0x130] sm:$0xff]  ;;  %v105_v58 = vld [vmem:[#allocation5 + $0x148] sm:$0xff] }
  0x46   :  { %724 = vmatpush1.bf16.msra.mxu1 %v723_v38  ;;  %662 = vmatprep.subr.bf16.mxu0 %v661_v39  ;;  %v109_v59 = vld [vmem:[#allocation5 + $0x168] sm:$0xff]  ;;  %v107_v60 = vld [vmem:[#allocation5 + $0x158] sm:$0xff]  ;;  %v667_v62 = vpack.c.bf16 %v100_v54, %v96_v53  ;;  %v731_v63 = vpack.c.bf16 %v102_v57, %v98_v55  ;;  %v104_v1 = vld [vmem:[#allocation5 + $0x140] sm:$0xff] }
  0x47   :  { %726 = vmatprep.subr.bf16.mxu1 %v725_v43  ;;  %v111_v61 = vld [vmem:[#allocation5 + $0x178] sm:$0xff]  ;;  %v669_v0 = vpack.c.bf16 %v109_v59, %v105_v58  ;;  %v108_v2 = vld [vmem:[#allocation5 + $0x160] sm:$0xff]  ;;  %v106_v3 = vld [vmem:[#allocation5 + $0x150] sm:$0xff] }
  0x48   :  { %v733_v4 = vpack.c.bf16 %v111_v61, %v107_v60  ;;  %v110_v5 = vld [vmem:[#allocation5 + $0x170] sm:$0xff]  ;;  %v113_v6 = vld [vmem:[#allocation5 + $0x188] sm:$0xff]  ;;  %v115_v8 = vld [vmem:[#allocation5 + $0x198] sm:$0xff]  ;;  %v671_v10 = vpack.c.bf16 %v108_v2, %v104_v1 }
  0x49   :  { %664 = vmatpush1.bf16.msra.mxu0 %v663_v50  ;;  %v117_v7 = vld [vmem:[#allocation5 + $0x1a8] sm:$0xff]  ;;  %v119_v9 = vld [vmem:[#allocation5 + $0x1b8] sm:$0xff]  ;;  %v735_v11 = vpack.c.bf16 %v110_v5, %v106_v3  ;;  %v112_v13 = vld [vmem:[#allocation5 + $0x180] sm:$0xff] }
  0x4a   :  { %728 = vmatpush1.bf16.msra.mxu1 %v727_v51  ;;  %666 = vmatprep.subr.bf16.mxu0 %v665_v52  ;;  %v673_v12 = vpack.c.bf16 %v117_v7, %v113_v6  ;;  %v116_v14 = vld [vmem:[#allocation5 + $0x1a0] sm:$0xff]  ;;  %v114_v15 = vld [vmem:[#allocation5 + $0x190] sm:$0xff]  ;;  %v737_v16 = vpack.c.bf16 %v119_v9, %v115_v8  ;;  %v121_v18 = vld [vmem:[#allocation5 + $0x1c8] sm:$0xff] }
  0x4b   :  { %730 = vmatprep.subr.bf16.mxu1 %v729_v56  ;;  %v118_v17 = vld [vmem:[#allocation5 + $0x1b0] sm:$0xff]  ;;  %v125_v19 = vld [vmem:[#allocation5 + $0x1e8] sm:$0xff]  ;;  %v123_v20 = vld [vmem:[#allocation5 + $0x1d8] sm:$0xff]  ;;  %v675_v22 = vpack.c.bf16 %v116_v14, %v112_v13 }
  0x4c   :  { %v127_v21 = vld [vmem:[#allocation5 + $0x1f8] sm:$0xff]  ;;  %v739_v23 = vpack.c.bf16 %v118_v17, %v114_v15  ;;  %v677_v24 = vpack.c.bf16 %v125_v19, %v121_v18  ;;  %v120_v25 = vld [vmem:[#allocation5 + $0x1c0] sm:$0xff]  ;;  %v122_v27 = vld [vmem:[#allocation5 + $0x1d0] sm:$0xff] }
  0x4d   :  { %668 = vmatpush1.bf16.msra.mxu0 %v667_v62  ;;  %v124_v26 = vld [vmem:[#allocation5 + $0x1e0] sm:$0xff]  ;;  %v741_v28 = vpack.c.bf16 %v127_v21, %v123_v20  ;;  %v126_v29 = vld [vmem:[#allocation5 + $0x1f0] sm:$0xff]  ;;  %v129_v30 = vld [vmem:[#allocation5 + $0x208] sm:$0xff] }
  0x4e   :  { %732 = vmatpush1.bf16.msra.mxu1 %v731_v63  ;;  %670 = vmatprep.subr.bf16.mxu0 %v669_v0  ;;  %v133_v31 = vld [vmem:[#allocation5 + $0x228] sm:$0xff]  ;;  %v131_v32 = vld [vmem:[#allocation5 + $0x218] sm:$0xff]  ;;  %v679_v34 = vpack.c.bf16 %v124_v26, %v120_v25  ;;  %v743_v35 = vpack.c.bf16 %v126_v29, %v122_v27  ;;  %v128_v37 = vld [vmem:[#allocation5 + $0x200] sm:$0xff] }
  0x4f   :  { %734 = vmatprep.subr.bf16.mxu1 %v733_v4  ;;  %v135_v33 = vld [vmem:[#allocation5 + $0x238] sm:$0xff]  ;;  %v681_v36 = vpack.c.bf16 %v133_v31, %v129_v30  ;;  %v132_v38 = vld [vmem:[#allocation5 + $0x220] sm:$0xff]  ;;  %v130_v39 = vld [vmem:[#allocation5 + $0x210] sm:$0xff] }
  0x50   :  { %v745_v40 = vpack.c.bf16 %v135_v33, %v131_v32  ;;  %v134_v41 = vld [vmem:[#allocation5 + $0x230] sm:$0xff]  ;;  %v137_v42 = vld [vmem:[#allocation5 + $0x248] sm:$0xff]  ;;  %v139_v44 = vld [vmem:[#allocation5 + $0x258] sm:$0xff]  ;;  %v683_v46 = vpack.c.bf16 %v132_v38, %v128_v37 }
  0x51   :  { %672 = vmatpush1.bf16.msra.mxu0 %v671_v10  ;;  %v141_v43 = vld [vmem:[#allocation5 + $0x268] sm:$0xff]  ;;  %v143_v45 = vld [vmem:[#allocation5 + $0x278] sm:$0xff]  ;;  %v747_v47 = vpack.c.bf16 %v134_v41, %v130_v39  ;;  %v136_v49 = vld [vmem:[#allocation5 + $0x240] sm:$0xff] }
  0x52   :  { %736 = vmatpush1.bf16.msra.mxu1 %v735_v11  ;;  %674 = vmatprep.subr.bf16.mxu0 %v673_v12  ;;  %v685_v48 = vpack.c.bf16 %v141_v43, %v137_v42  ;;  %v140_v50 = vld [vmem:[#allocation5 + $0x260] sm:$0xff]  ;;  %v138_v51 = vld [vmem:[#allocation5 + $0x250] sm:$0xff]  ;;  %v749_v52 = vpack.c.bf16 %v143_v45, %v139_v44  ;;  %v145_v54 = vld [vmem:[#allocation5 + $0x288] sm:$0xff] }
  0x53   :  { %738 = vmatprep.subr.bf16.mxu1 %v737_v16  ;;  %v142_v53 = vld [vmem:[#allocation5 + $0x270] sm:$0xff]  ;;  %v149_v55 = vld [vmem:[#allocation5 + $0x2a8] sm:$0xff]  ;;  %v147_v56 = vld [vmem:[#allocation5 + $0x298] sm:$0xff]  ;;  %v687_v58 = vpack.c.bf16 %v140_v50, %v136_v49 }
  0x54   :  { %v151_v57 = vld [vmem:[#allocation5 + $0x2b8] sm:$0xff]  ;;  %v751_v59 = vpack.c.bf16 %v142_v53, %v138_v51  ;;  %v689_v60 = vpack.c.bf16 %v149_v55, %v145_v54  ;;  %v144_v61 = vld [vmem:[#allocation5 + $0x280] sm:$0xff]  ;;  %v146_v63 = vld [vmem:[#allocation5 + $0x290] sm:$0xff] }
  0x55   :  { %676 = vmatpush1.bf16.msra.mxu0 %v675_v22  ;;  %v148_v62 = vld [vmem:[#allocation5 + $0x2a0] sm:$0xff]  ;;  %v753_v0 = vpack.c.bf16 %v151_v57, %v147_v56  ;;  %v150_v1 = vld [vmem:[#allocation5 + $0x2b0] sm:$0xff]  ;;  %v153_v2 = vld [vmem:[#allocation5 + $0x2c8] sm:$0xff] }
  0x56   :  { %740 = vmatpush1.bf16.msra.mxu1 %v739_v23  ;;  %678 = vmatprep.subr.bf16.mxu0 %v677_v24  ;;  %v157_v3 = vld [vmem:[#allocation5 + $0x2e8] sm:$0xff]  ;;  %v155_v4 = vld [vmem:[#allocation5 + $0x2d8] sm:$0xff]  ;;  %v691_v6 = vpack.c.bf16 %v148_v62, %v144_v61  ;;  %v152_v7 = vld [vmem:[#allocation5 + $0x2c0] sm:$0xff]  ;;  %v755_v8 = vpack.c.bf16 %v150_v1, %v146_v63 }
  0x57   :  { %742 = vmatprep.subr.bf16.mxu1 %v741_v28  ;;  %v159_v5 = vld [vmem:[#allocation5 + $0x2f8] sm:$0xff]  ;;  %v693_v9 = vpack.c.bf16 %v157_v3, %v153_v2  ;;  %v156_v10 = vld [vmem:[#allocation5 + $0x2e0] sm:$0xff]  ;;  %v154_v11 = vld [vmem:[#allocation5 + $0x2d0] sm:$0xff] }
  0x58   :  { %v158_v12 = vld [vmem:[#allocation5 + $0x2f0] sm:$0xff]  ;;  %v757_v13 = vpack.c.bf16 %v159_v5, %v155_v4  ;;  %v161_v14 = vld [vmem:[#allocation5 + $0x308] sm:$0xff]  ;;  %v163_v17 = vld [vmem:[#allocation5 + $0x318] sm:$0xff]  ;;  %v695_v19 = vpack.c.bf16 %v156_v10, %v152_v7 }
  0x59   :  { %680 = vmatpush1.bf16.msra.mxu0 %v679_v34  ;;  %v165_v15 = vld [vmem:[#allocation5 + $0x328] sm:$0xff]  ;;  %v167_v18 = vld [vmem:[#allocation5 + $0x338] sm:$0xff]  ;;  %v759_v20 = vpack.c.bf16 %v158_v12, %v154_v11  ;;  %v160_v22 = vld [vmem:[#allocation5 + $0x300] sm:$0xff] }
  0x5a   :  { %744 = vmatpush1.bf16.msra.mxu1 %v743_v35  ;;  %682 = vmatprep.subr.bf16.mxu0 %v681_v36  ;;  %v57_v16 = vld [vmem:[#allocation2 + $0x8] sm:$0xff]  ;;  %v697_v21 = vpack.c.bf16 %v165_v15, %v161_v14  ;;  %v164_v23 = vld [vmem:[#allocation5 + $0x320] sm:$0xff]  ;;  %v162_v24 = vld [vmem:[#allocation5 + $0x310] sm:$0xff]  ;;  %v761_v25 = vpack.c.bf16 %v167_v18, %v163_v17 }
  0x5b   :  { %746 = vmatprep.subr.bf16.mxu1 %v745_v40  ;;  %256 = vmatprep.mubr.f32.mxu0 %v57_v16  ;;  %v166_v26 = vld [vmem:[#allocation5 + $0x330] sm:$0xff]  ;;  %v169_v27 = vld [vmem:[#allocation5 + $0x348] sm:$0xff]  ;;  %v171_v29 = vld [vmem:[#allocation5 + $0x358] sm:$0xff]  ;;  %v699_v31 = vpack.c.bf16 %v164_v23, %v160_v22 }
  0x5c   :  { %345 = vmatprep.mubr.f32.mxu1 %v57_v16  ;;  %v173_v28 = vld [vmem:[#allocation5 + $0x368] sm:$0xff]  ;;  %v175_v30 = vld [vmem:[#allocation5 + $0x378] sm:$0xff]  ;;  %v763_v32 = vpack.c.bf16 %v166_v26, %v162_v24  ;;  %v168_v34 = vld [vmem:[#allocation5 + $0x340] sm:$0xff] }
  0x5d   :  { %684 = vmatpush1.bf16.msra.mxu0 %v683_v46  ;;  %v701_v33 = vpack.c.bf16 %v173_v28, %v169_v27  ;;  %v172_v35 = vld [vmem:[#allocation5 + $0x360] sm:$0xff]  ;;  %v170_v36 = vld [vmem:[#allocation5 + $0x350] sm:$0xff]  ;;  %v765_v37 = vpack.c.bf16 %v175_v30, %v171_v29  ;;  %v177_v39 = vld [vmem:[#allocation5 + $0x388] sm:$0xff] }
  0x5e   :  { %748 = vmatpush1.bf16.msra.mxu1 %v747_v47  ;;  %686 = vmatprep.subr.bf16.mxu0 %v685_v48  ;;  %v174_v38 = vld [vmem:[#allocation5 + $0x370] sm:$0xff]  ;;  %v181_v40 = vld [vmem:[#allocation5 + $0x3a8] sm:$0xff]  ;;  %v179_v41 = vld [vmem:[#allocation5 + $0x398] sm:$0xff]  ;;  %v703_v43 = vpack.c.bf16 %v172_v35, %v168_v34 }
  0x5f   :  { %750 = vmatprep.subr.bf16.mxu1 %v749_v52  ;;  %v183_v42 = vld [vmem:[#allocation5 + $0x3b8] sm:$0xff]  ;;  %v767_v44 = vpack.c.bf16 %v174_v38, %v170_v36  ;;  %v705_v45 = vpack.c.bf16 %v181_v40, %v177_v39  ;;  %v176_v46 = vld [vmem:[#allocation5 + $0x380] sm:$0xff]  ;;  %v178_v48 = vld [vmem:[#allocation5 + $0x390] sm:$0xff] }
  0x60   :  { %v180_v47 = vld [vmem:[#allocation5 + $0x3a0] sm:$0xff]  ;;  %v769_v49 = vpack.c.bf16 %v183_v42, %v179_v41  ;;  %v182_v50 = vld [vmem:[#allocation5 + $0x3b0] sm:$0xff]  ;;  %v185_v51 = vld [vmem:[#allocation5 + $0x3c8] sm:$0xff] }
  0x61   :  { %688 = vmatpush1.bf16.msra.mxu0 %v687_v58  ;;  %v189_v52 = vld [vmem:[#allocation5 + $0x3e8] sm:$0xff]  ;;  %v187_v53 = vld [vmem:[#allocation5 + $0x3d8] sm:$0xff]  ;;  %v707_v55 = vpack.c.bf16 %v180_v47, %v176_v46  ;;  %v771_v56 = vpack.c.bf16 %v182_v50, %v178_v48  ;;  %v184_v58 = vld [vmem:[#allocation5 + $0x3c0] sm:$0xff] }
  0x62   :  { %752 = vmatpush1.bf16.msra.mxu1 %v751_v59  ;;  %690 = vmatprep.subr.bf16.mxu0 %v689_v60  ;;  %v191_v54 = vld [vmem:[#allocation5 + $0x3f8] sm:$0xff]  ;;  %v709_v57 = vpack.c.bf16 %v189_v52, %v185_v51  ;;  %v188_v59 = vld [vmem:[#allocation5 + $0x3e0] sm:$0xff]  ;;  %v186_v60 = vld [vmem:[#allocation5 + $0x3d0] sm:$0xff] }
  0x63   :  { %754 = vmatprep.subr.bf16.mxu1 %v753_v0  ;;  %v773_v61 = vpack.c.bf16 %v191_v54, %v187_v53  ;;  %v190_v62 = vld [vmem:[#allocation5 + $0x3f0] sm:$0xff]  ;;  %v466_v63 = vld [vmem:[#allocation7 + $0x80] sm:$0xff]  ;;  %v467_v0 = vld [vmem:[#allocation7 + $0x88] sm:$0xff]  ;;  %v711_v1 = vpack.c.bf16 %v188_v59, %v184_v58 }
  0x64   :  { %v775_v2 = vpack.c.bf16 %v190_v62, %v186_v60  ;;  %v777_v3 = vpack.c.bf16 %v467_v0, %v466_v63  ;;  %v450_v4 = vld [vmem:[#allocation7] sm:$0xff]  ;;  %v451_v5 = vld [vmem:[#allocation7 + $0x8] sm:$0xff]  ;;  %v469_v7 = vld [vmem:[#allocation7 + $0x98] sm:$0xff] }
  0x65   :  { %692 = vmatpush1.bf16.msra.mxu0 %v691_v6  ;;  %v468_v6 = vld [vmem:[#allocation7 + $0x90] sm:$0xff]  ;;  %v779_v10 = vpack.c.bf16 %v451_v5, %v450_v4  ;;  %v470_v14 = vld [vmem:[#allocation7 + $0xa0] sm:$0xff]  ;;  %v471_v15 = vld [vmem:[#allocation7 + $0xa8] sm:$0xff] }
  0x66   :  { %756 = vmatpush1.bf16.msra.mxu1 %v755_v8  ;;  %694 = vmatprep.subr.bf16.mxu0 %v693_v9  ;;  %v56_v8 = vld [vmem:[#allocation2] sm:$0xff]  ;;  %v59_v9 = vld [vmem:[#allocation2 + $0x18] sm:$0xff]  ;;  %v781_v11 = vpack.c.bf16 %v469_v7, %v468_v6  ;;  %v452_v12 = vld [vmem:[#allocation7 + $0x10] sm:$0xff] }
  0x67   :  { %758 = vmatprep.subr.bf16.mxu1 %v757_v13  ;;  %v453_v13 = vld [vmem:[#allocation7 + $0x18] sm:$0xff]  ;;  %v58_v16 = vld [vmem:[#allocation2 + $0x10] sm:$0xff]  ;;  %v61_v17 = vld [vmem:[#allocation2 + $0x28] sm:$0xff] }
  0x68   :  { %v783_v18 = vpack.c.bf16 %v453_v13, %v452_v12  ;;  %v60_v22 = vld [vmem:[#allocation2 + $0x20] sm:$0xff]  ;;  %v63_v23 = vld [vmem:[#allocation2 + $0x38] sm:$0xff]  ;;  %v472_v26 = vld [vmem:[#allocation7 + $0xb0] sm:$0xff] }
  0x69   :  { %696 = vmatpush1.bf16.msra.mxu0 %v695_v19  ;;  %v785_v19 = vpack.c.bf16 %v471_v15, %v470_v14  ;;  %v473_v27 = vld [vmem:[#allocation7 + $0xb8] sm:$0xff]  ;;  %v456_v29 = vld [vmem:[#allocation7 + $0x30] sm:$0xff]  ;;  %v458_v35 = vld [vmem:[#allocation7 + $0x40] sm:$0xff] }
  0x6a   :  { %760 = vmatpush1.bf16.msra.mxu1 %v759_v20  ;;  %698 = vmatprep.subr.bf16.mxu0 %v697_v21  ;;  %v454_v20 = vld [vmem:[#allocation7 + $0x20] sm:$0xff]  ;;  %v455_v21 = vld [vmem:[#allocation7 + $0x28] sm:$0xff]  ;;  %v789_v28 = vpack.c.bf16 %v473_v27, %v472_v26  ;;  %v457_v30 = vld [vmem:[#allocation7 + $0x38] sm:$0xff] }
  0x6b   :  { %762 = vmatprep.subr.bf16.mxu1 %v761_v25  ;;  %v787_v24 = vpack.c.bf16 %v455_v21, %v454_v20  ;;  %v62_v25 = vld [vmem:[#allocation2 + $0x30] sm:$0xff]  ;;  %v459_v36 = vld [vmem:[#allocation7 + $0x48] sm:$0xff]  ;;  %v477_v39 = vld [vmem:[#allocation7 + $0xd8] sm:$0xff] }
  0x6c   :  { %v476_v38 = vld [vmem:[#allocation7 + $0xd0] sm:$0xff]  ;;  %v461_v42 = vld [vmem:[#allocation7 + $0x58] sm:$0xff]  ;;  %v462_v47 = vld [vmem:[#allocation7 + $0x60] sm:$0xff] }
  0x6d   :  { %700 = vmatpush1.bf16.msra.mxu0 %v699_v31  ;;  %v791_v31 = vpack.c.bf16 %v457_v30, %v456_v29  ;;  %v797_v40 = vpack.c.bf16 %v477_v39, %v476_v38  ;;  %v460_v41 = vld [vmem:[#allocation7 + $0x50] sm:$0xff]  ;;  %v463_v48 = vld [vmem:[#allocation7 + $0x68] sm:$0xff]  ;;  %v481_v51 = vld [vmem:[#allocation7 + $0xf8] sm:$0xff] }
  0x6e   :  { %764 = vmatpush1.bf16.msra.mxu1 %v763_v32  ;;  %702 = vmatprep.subr.bf16.mxu0 %v701_v33  ;;  %v474_v32 = vld [vmem:[#allocation7 + $0xc0] sm:$0xff]  ;;  %v475_v33 = vld [vmem:[#allocation7 + $0xc8] sm:$0xff]  ;;  %v480_v50 = vld [vmem:[#allocation7 + $0xf0] sm:$0xff] }
  0x6f   :  { %766 = vmatprep.subr.bf16.mxu1 %v765_v37  ;;  %v793_v34 = vpack.c.bf16 %v475_v33, %v474_v32  ;;  %v795_v37 = vpack.c.bf16 %v459_v36, %v458_v35  ;;  %v805_v52 = vpack.c.bf16 %v481_v51, %v480_v50  ;;  %v464_v53 = vld [vmem:[#allocation7 + $0x70] sm:$0xff]  ;;  %v465_v54 = vld [vmem:[#allocation7 + $0x78] sm:$0xff] }
  0x71   :  { %704 = vmatpush1.bf16.msra.mxu0 %v703_v43  ;;  %v799_v43 = vpack.c.bf16 %v461_v42, %v460_v41 }
  0x72   :  { %768 = vmatpush1.bf16.msra.mxu1 %v767_v44  ;;  %706 = vmatprep.subr.bf16.mxu0 %v705_v45  ;;  %v478_v44 = vld [vmem:[#allocation7 + $0xe0] sm:$0xff]  ;;  %v479_v45 = vld [vmem:[#allocation7 + $0xe8] sm:$0xff] }
  0x73   :  { %770 = vmatprep.subr.bf16.mxu1 %v769_v49  ;;  %v801_v46 = vpack.c.bf16 %v479_v45, %v478_v44  ;;  %v803_v49 = vpack.c.bf16 %v463_v48, %v462_v47 }
  0x75   :  { %708 = vmatpush1.bf16.msra.mxu0 %v707_v55  ;;  %v807_v55 = vpack.c.bf16 %v465_v54, %v464_v53 }
  0x76   :  { %772 = vmatpush1.bf16.msra.mxu1 %v771_v56  ;;  %710 = vmatprep.subr.bf16.mxu0 %v709_v57 }
  0x77   :  { %774 = vmatprep.subr.bf16.mxu1 %v773_v61 }
  0x79   :  { %712 = vmatpush1.bf16.msra.mxu0 %v711_v1 }
  0x7a   :  { %776 = vmatpush1.bf16.msra.mxu1 %v775_v2  ;;  %778 = vmatprep.subr.bf16.mxu0 %v777_v3 }
  0x7b   :  { %809 = vmatprep.subr.bf16.mxu1 %v777_v3 }
  0x7c   :  { %257 = vmatmul.mubr.f32.vlgmr.msra.gmra.mrb[0].mxu0 %v56_v8 }
  0x7d   :  { %346 = vmatmul.mubr.f32.vlgmr.msra.gmra.mrb[0].mxu1 %v56_v8  ;;  %262 = vmatprep.mubr.f32.mxu0 %v59_v9 }
  0x7e   :  { %351 = vmatprep.mubr.f32.mxu1 %v59_v9  ;;  %780 = vmatpush3.bf16.msra.mxu0 %v779_v10 }
  0x7f   :  { %782 = vmatprep.subr.bf16.mxu0 %v781_v11  ;;  %817 = vmatpush3.bf16.msra.mxu1 %v779_v10 }
  0x80   :  { %263 = vmatmul.mubr.f32.gmra.mrb[2].mxu0 %v58_v16  ;;  %810 = vmatprep.subr.bf16.mxu1 %v781_v11 }
  0x81   :  { %352 = vmatmul.mubr.f32.gmra.mrb[2].mxu1 %v58_v16  ;;  %268 = vmatprep.mubr.f32.mxu0 %v61_v17 }
  0x82   :  { %357 = vmatprep.mubr.f32.mxu1 %v61_v17  ;;  %784 = vmatpush3.bf16.msra.mxu0 %v783_v18 }
  0x83   :  { %786 = vmatprep.subr.bf16.mxu0 %v785_v19  ;;  %818 = vmatpush3.bf16.msra.mxu1 %v783_v18 }
  0x84   :  { %269 = vmatmul.mubr.f32.gmra.mrb[4].mxu0 %v60_v22  ;;  %811 = vmatprep.subr.bf16.mxu1 %v785_v19 }
  0x85   :  { %358 = vmatmul.mubr.f32.gmra.mrb[4].mxu1 %v60_v22  ;;  %274 = vmatprep.mubr.f32.mxu0 %v63_v23 }
  0x86   :  { %363 = vmatprep.mubr.f32.mxu1 %v63_v23  ;;  %788 = vmatpush3.bf16.msra.mxu0 %v787_v24 }
  0x87   :  { %819 = vmatpush3.bf16.msra.mxu1 %v787_v24  ;;  %790 = vmatprep.subr.bf16.mxu0 %v789_v28 }
  0x88   :  { %275 = vmatmul.mubr.f32.gmra.mrb[6].mxu0 %v62_v25  ;;  %812 = vmatprep.subr.bf16.mxu1 %v789_v28 }
  0x89   :  { %364 = vmatmul.mubr.f32.gmra.mrb[6].mxu1 %v62_v25 }
  0x8a   :  { %792 = vmatpush3.bf16.msra.mxu0 %v791_v31 }
  0x8b   :  { %820 = vmatpush3.bf16.msra.mxu1 %v791_v31  ;;  %794 = vmatprep.subr.bf16.mxu0 %v793_v34 }
  0x8c   :  { %813 = vmatprep.subr.bf16.mxu1 %v793_v34 }
  0x8e   :  { %796 = vmatpush3.bf16.msra.mxu0 %v795_v37 }
  0x8f   :  { %821 = vmatpush3.bf16.msra.mxu1 %v795_v37  ;;  %798 = vmatprep.subr.bf16.mxu0 %v797_v40 }
  0x90   :  { %814 = vmatprep.subr.bf16.mxu1 %v797_v40 }
  0x92   :  { %800 = vmatpush3.bf16.msra.mxu0 %v799_v43 }
  0x93   :  { %822 = vmatpush3.bf16.msra.mxu1 %v799_v43  ;;  %802 = vmatprep.subr.bf16.mxu0 %v801_v46 }
  0x94   :  { %815 = vmatprep.subr.bf16.mxu1 %v801_v46 }
  0x96   :  { %804 = vmatpush3.bf16.msra.mxu0 %v803_v49 }
  0x97   :  { %823 = vmatpush3.bf16.msra.mxu1 %v803_v49  ;;  %806 = vmatprep.subr.bf16.mxu0 %v805_v52 }
  0x98   :  { %816 = vmatprep.subr.bf16.mxu1 %v805_v52 }
  0x9a   :  { %808 = vmatpush3.bf16.msra.mxu0 %v807_v55 }
  0x9b   :  { %824 = vmatpush3.bf16.msra.mxu1 %v807_v55 }
 0x14f   :  { %v258_v56 = vpop.f32.mrb[0].mxu0 }
 0x150   :  { %v370_v57 = vmul.f32 %v258_v56, %v258_v56  ;;  %v347_v58 = vpop.f32.mrb[0].mxu1  ;;  %v260_v59 = vpop.f32.mrb[1].mxu0 }
 0x151   :  { %v378_v60 = vmul.f32 %v347_v58, %v347_v58  ;;  %v371_v61 = vmul.f32 %v260_v59, %v260_v59  ;;  %v349_v62 = vpop.f32.mrb[1].mxu1 }
 0x152   :  { %v379_v63 = vmul.f32 %v349_v62, %v349_v62 }
 0x153   :  { %v386_v0 = vadd.f32 %v378_v60, %v370_v57  ;;  %v264_v1 = vpop.f32.mrb[2].mxu0 }
 0x154   :  { %v387_v2 = vadd.f32 %v379_v63, %v371_v61  ;;  %v372_v3 = vmul.f32 %v264_v1, %v264_v1  ;;  %v353_v4 = vpop.f32.mrb[2].mxu1  ;;  %v266_v5 = vpop.f32.mrb[3].mxu0 }
 0x155   :  { %835 = vrsqrt.f32 %v386_v0  ;;  %v380_v6 = vmul.f32 %v353_v4, %v353_v4  ;;  %v373_v7 = vmul.f32 %v266_v5, %v266_v5  ;;  %v355_v8 = vpop.f32.mrb[3].mxu1  ;;  %vm396_vm0 = vcmp.eq.f32.partialorder %v386_v0, inf }
 0x156   :  { %v381_v9 = vmul.f32 %v355_v8, %v355_v8  ;;  %837 = vrsqrt.f32 %v387_v2  ;;  %vm403_vm1 = vcmp.eq.f32.partialorder %v387_v2, inf  ;;  %v406_v36 = vand.u32 2147483648, %v387_v2 }
 0x157   :  { %v1022_v10 = vadd.f32 %v380_v6, %v372_v3  ;;  %v270_v11 = vpop.f32.mrb[4].mxu0  ;;  %vm405_vm2 = vcmp.eq.f32.partialorder %v387_v2, 0.0  ;;  %v399_v40 = vand.u32 2147483648, %v386_v0  ;;  %vm398_vm3 = vcmp.eq.f32.partialorder %v386_v0, 0.0 }
 0x158   :  { %v389_v12 = vadd.f32 %v381_v9, %v373_v7  ;;  %v374_v13 = vmul.f32 %v270_v11, %v270_v11  ;;  %v359_v14 = vpop.f32.mrb[4].mxu1  ;;  %v272_v15 = vpop.f32.mrb[5].mxu0 }
 0x159   :  { %v382_v16 = vmul.f32 %v359_v14, %v359_v14  ;;  %v375_v17 = vmul.f32 %v272_v15, %v272_v15  ;;  %v361_v18 = vpop.f32.mrb[5].mxu1  ;;  %839 = vrsqrt.f32 %v1022_v10  ;;  %vm410_vm4 = vcmp.eq.f32.partialorder %v1022_v10, inf }
 0x15a   :  { %v383_v19 = vmul.f32 %v361_v18, %v361_v18  ;;  %841 = vrsqrt.f32 %v389_v12  ;;  %vm417_vm5 = vcmp.eq.f32.partialorder %v389_v12, inf  ;;  %v420_v46 = vand.u32 2147483648, %v389_v12 }
 0x15b   :  { %v1025_v20 = vadd.f32 %v382_v16, %v374_v13  ;;  %v276_v21 = vpop.f32.mrb[6].mxu0  ;;  %vm419_vm6 = vcmp.eq.f32.partialorder %v389_v12, 0.0  ;;  %v413_v50 = vand.u32 2147483648, %v1022_v10  ;;  %vm412_vm7 = vcmp.eq.f32.partialorder %v1022_v10, 0.0 }
 0x15c   :  { %v391_v22 = vadd.f32 %v383_v19, %v375_v17  ;;  %v376_v23 = vmul.f32 %v276_v21, %v276_v21  ;;  %v365_v24 = vpop.f32.mrb[6].mxu1  ;;  %v278_v25 = vpop.f32.mrb[7].mxu0 }
 0x15d   :  { %843 = vrsqrt.f32 %v1025_v20  ;;  %v384_v26 = vmul.f32 %v365_v24, %v365_v24  ;;  %v377_v27 = vmul.f32 %v278_v25, %v278_v25  ;;  %v367_v28 = vpop.f32.mrb[7].mxu1  ;;  %vm424_vm8 = vcmp.eq.f32.partialorder %v1025_v20, inf }
 0x15e   :  { %v385_v29 = vmul.f32 %v367_v28, %v367_v28  ;;  %845 = vrsqrt.f32 %v391_v22  ;;  %vm431_vm9 = vcmp.eq.f32.partialorder %v391_v22, inf  ;;  %v434_v56 = vand.u32 2147483648, %v391_v22 }
 0x15f   :  { %v836_v30 = vpop.eup %835  ;;  %v1028_v31 = vadd.f32 %v384_v26, %v376_v23  ;;  %vm433_vm10 = vcmp.eq.f32.partialorder %v391_v22, 0.0  ;;  %v427_v60 = vand.u32 2147483648, %v1025_v20  ;;  %vm426_vm11 = vcmp.eq.f32.partialorder %v1025_v20, 0.0 }
 0x160   :  { %v838_v32 = vpop.eup %837  ;;  %v393_v33 = vadd.f32 %v385_v29, %v377_v27  ;;  %v395_v34 = vmul.f32 %v836_v30, %v386_v0 }
 0x161   :  { %v402_v35 = vmul.f32 %v838_v32, %v387_v2  ;;  %847 = vrsqrt.f32 %v1028_v31  ;;  %vm438_vm12 = vcmp.eq.f32.partialorder %v1028_v31, inf  ;;  %v441_v5 = vand.u32 2147483648, %v1028_v31 }
 0x162   :  { %v397_v37 = vsel %vm396_vm0, %v386_v0, %v395_v34  ;;  %849 = vrsqrt.f32 %v393_v33  ;;  %vm445_vm13 = vcmp.eq.f32.partialorder %v393_v33, inf  ;;  %vm447_vm14 = vcmp.eq.f32.partialorder %v393_v33, 0.0 }
 0x163   :  { %v840_v38 = vpop.eup %839  ;;  %v404_v39 = vsel %vm403_vm1, %v387_v2, %v402_v35  ;;  %v400_v44 = vsel %vm398_vm3, %v399_v40, %v397_v37  ;;  %v448_v2 = vand.u32 2147483648, %v393_v33  ;;  %vm440_vm15 = vcmp.eq.f32.partialorder %v1028_v31, 0.0 }
 0x164   :  { %v842_v41 = vpop.eup %841  ;;  %v407_v42 = vsel %vm405_vm2, %v406_v36, %v404_v39  ;;  %v409_v43 = vmul.f32 %v840_v38, %v1022_v10 }
 0x165   :  { %546 = vmatprep.mubr.f32.mxu0 %v407_v42  ;;  %v416_v45 = vmul.f32 %v842_v41, %v389_v12 }
 0x166   :  { %547 = vmatmul.mubr.f32.vlgmr.msra.gmra.mrb[8].mxu0 %v400_v44  ;;  %v411_v47 = vsel %vm410_vm4, %v1022_v10, %v409_v43 }
 0x167   :  { %v844_v48 = vpop.eup %843  ;;  %v418_v49 = vsel %vm417_vm5, %v389_v12, %v416_v45  ;;  %v414_v54 = vsel %vm412_vm7, %v413_v50, %v411_v47 }
 0x168   :  { %v846_v51 = vpop.eup %845  ;;  %v421_v52 = vsel %vm419_vm6, %v420_v46, %v418_v49  ;;  %v423_v53 = vmul.f32 %v844_v48, %v1025_v20 }
 0x169   :  { %551 = vmatprep.mubr.f32.mxu0 %v421_v52  ;;  %v430_v55 = vmul.f32 %v846_v51, %v391_v22 }
 0x16a   :  { %552 = vmatmul.mubr.f32.gmra.mrb[10].mxu0 %v414_v54  ;;  %v425_v57 = vsel %vm424_vm8, %v1025_v20, %v423_v53 }
 0x16b   :  { %v848_v58 = vpop.eup %847  ;;  %v432_v59 = vsel %vm431_vm9, %v391_v22, %v430_v55  ;;  %v428_v0 = vsel %vm426_vm11, %v427_v60, %v425_v57 }
 0x16c   :  { %v850_v61 = vpop.eup %849  ;;  %v435_v62 = vsel %vm433_vm10, %v434_v56, %v432_v59  ;;  %v437_v63 = vmul.f32 %v848_v58, %v1028_v31 }
 0x16d   :  { %556 = vmatprep.mubr.f32.mxu1 %v435_v62  ;;  %v444_v1 = vmul.f32 %v850_v61, %v393_v33 }
 0x16e   :  { %557 = vmatmul.mubr.f32.vlgmr.msra.gmra.mrb[8].mxu1 %v428_v0  ;;  %v439_v3 = vsel %vm438_vm12, %v1028_v31, %v437_v63 }
 0x16f   :  { %v446_v4 = vsel %vm445_vm13, %v393_v33, %v444_v1  ;;  %v442_v7 = vsel %vm440_vm15, %v441_v5, %v439_v3 }
 0x170   :  { %v449_v6 = vsel %vm447_vm14, %v448_v2, %v446_v4 }
 0x171   :  { %561 = vmatprep.mubr.f32.mxu1 %v449_v6 }
 0x172   :  { %562 = vmatmul.mubr.f32.gmra.mrb[10].mxu1 %v442_v7 }
 0x239   :  { %v637_v8 = vpop.f32.mrb[8].mxu0 }
 0x23a   :  { %v638_v9 = vpop.f32.mrb[9].mxu0 }
 0x23b   :  { %v639_v10 = vadd.f32 %v638_v9, %v637_v8 }
 0x23d   :  { %v567_v11 = vmax.f32 %v639_v10, 1e-05  ;;  %v640_v12 = vpop.f32.mrb[10].mxu0 }
 0x23e   :  { %v641_v13 = vpop.f32.mrb[11].mxu0 }
 0x23f   :  { %851 = vlog2.f32 %v567_v11  ;;  %v642_v14 = vadd.f32 %v641_v13, %v640_v12 }
 0x241   :  { %v568_v15 = vmax.f32 %v642_v14, 1e-05  ;;  %v643_v16 = vpop.f32.mrb[8].mxu1 }
 0x242   :  { %v644_v17 = vpop.f32.mrb[9].mxu1 }
 0x243   :  { %853 = vlog2.f32 %v568_v15  ;;  %v645_v18 = vadd.f32 %v644_v17, %v643_v16 }
 0x245   :  { %v569_v19 = vmax.f32 %v645_v18, 1e-05  ;;  %v646_v20 = vpop.f32.mrb[10].mxu1 }
 0x246   :  { %v647_v21 = vpop.f32.mrb[11].mxu1 }
 0x247   :  { %855 = vlog2.f32 %v569_v19  ;;  %v648_v22 = vadd.f32 %v647_v21, %v646_v20 }
 0x249   :  { %v852_v23 = vpop.eup %851  ;;  %v570_v24 = vmax.f32 %v648_v22, 1e-05 }
 0x24a   :  { %v572_v25 = vmul.f32 0.6931472, %v852_v23 }
 0x24b   :  { %857 = vlog2.f32 %v570_v24 }
 0x24c   :  { %v579_v26 = vmul.f32 0.4342945, %v572_v25 }
 0x24d   :  { %v854_v27 = vpop.eup %853 }
 0x24e   :  { %583 = vst [vmem:[#allocation8] sm:$0xff] %v579_v26  ;;  %v574_v28 = vmul.f32 0.6931472, %v854_v27 }
 0x250   :  { %v580_v29 = vmul.f32 0.4342945, %v574_v28 }
 0x251   :  { %v856_v30 = vpop.eup %855 }
 0x252   :  { %584 = vst [vmem:[#allocation8 + $0x8] sm:$0xff] %v580_v29  ;;  %v576_v31 = vmul.f32 0.6931472, %v856_v30 }
 0x254   :  { %v581_v32 = vmul.f32 0.4342945, %v576_v31 }
 0x255   :  { %v858_v33 = vpop.eup %857 }
 0x256   :  { %585 = vst [vmem:[#allocation8 + $0x10] sm:$0xff] %v581_v32  ;;  %v578_v34 = vmul.f32 0.6931472, %v858_v33 }
 0x258   :  { %v582_v35 = vmul.f32 0.4342945, %v578_v34 }
 0x25a   :  { %586 = vst [vmem:[#allocation8 + $0x18] sm:$0xff] %v582_v35 }
 0x25b   :  { %936 = shalt.err (!%p933_p0)
}
 0x25c   :  { %s937_s29 = scalar_lea.hbm %s1064_s3, 512 }
 0x25d   :  { %p938_p1 = scmp.ne.s32.totalorder %s1064_s3, %s937_s29  ;;  %p941_p2 = scmp.lt.u32.totalorder %s937_s29, %s1064_s3 }
 0x25f   :  { %p943_p3 = pnand %p941_p2, %p938_p1 }
 0x261   :  { %946 = shalt.err (!%p943_p3)
}
 0x262   :  { %598 = dma.vmem_to_hbm [thread:$0]  %s593_s25, 512, %s1064_s3, [#allocation4], %s960_s0, %s960_s0, %s961_s22  }
 0x263   :  { %951 = dma.done.wait [#allocation4], 512  }
 0x264   :  { %952 = vsyncadd [#allocation4], 4294966784 }
 0x265   :  { %602 = vsyncpa [#allocation3], 1 }
 0x266   :  { %603 = vsyncpa [#allocation6], 1 }
 0x267   :  { %604 = vsyncpa [#allocation4], 1 }

</bundles_post_ra>
